<compile_context>
chip_gen: v6e
topology: v6e:2x2x1
jax: 0.10.0
libtpu: 0.0.40
codegen_flags: <defaults>
</compile_context>

<pallas_src>
import functools

import jax
import jax.numpy as jnp
from jax.experimental import pallas as pl
from jax.experimental.pallas import tpu as pltpu

LOG_STD_MIN = -20.0
LOG_STD_MAX = 2.0


def _round_up(x, m):
    return ((x + m - 1) // m) * m


def policy_kernel(x_ref, w1_ref, b1_ref, w2_ref, b2_ref, wh_ref, bh_ref, o_ref,
                  *, num_actions):
    """Fused: linear1 -> relu -> linear2 -> relu -> [mean | clamped log_std | pad]."""
    # --- layer 1: Linear + ReLU (bf16 matmul, f32 accumulate, bf16 intermediate)
    x = x_ref[...]                                            # bf16
    h = jnp.dot(x, w1_ref[...], preferred_element_type=jnp.float32) + b1_ref[...]
    h = jnp.maximum(h, 0.0).astype(jnp.bfloat16)

    # --- layer 2: Linear + ReLU --------------------------------------------
    h = jnp.dot(h, w2_ref[...], preferred_element_type=jnp.float32) + b2_ref[...]
    h = jnp.maximum(h, 0.0).astype(jnp.bfloat16)

    # --- fused heads: [mean_linear | log_std_linear | zero pad] in one MXU pass
    heads = jnp.dot(h, wh_ref[...], preferred_element_type=jnp.float32) + bh_ref[...]

    # clamp only the log_std lanes (>= num_actions); mean lanes untouched.
    # Padding lanes are zero and clip(0) == 0, so clamping them is harmless.
    lane = jax.lax.broadcasted_iota(jnp.int32, heads.shape, dimension=1)
    clamped = jnp.clip(heads, LOG_STD_MIN, LOG_STD_MAX)
    o_ref[...] = jnp.where(lane >= num_actions, clamped, heads)


def init_params(key, num_inputs, num_actions, hidden_dim=(400, 300), init_w=3e-3):
    """Deterministic parameter init mirroring the PyTorch module's __init__."""
    h1, h2 = hidden_dim
    ks = jax.random.split(key, 8)

    def lin_init(kw, kb, fan_in, fan_out):
        bound = 1.0 / jnp.sqrt(fan_in)
        w = jax.random.uniform(kw, (fan_in, fan_out), jnp.float32, -bound, bound)
        b = jax.random.uniform(kb, (1, fan_out), jnp.float32, -bound, bound)
        return w, b

    w1, b1 = lin_init(ks[0], ks[1], num_inputs, h1)
    w2, b2 = lin_init(ks[2], ks[3], h1, h2)
    # mean_linear / log_std_linear: uniform_(-init_w, init_w)
    wm = jax.random.uniform(ks[4], (h2, num_actions), jnp.float32, -init_w, init_w)
    bm = jax.random.uniform(ks[5], (1, num_actions), jnp.float32, -init_w, init_w)
    ws = jax.random.uniform(ks[6], (h2, num_actions), jnp.float32, -init_w, init_w)
    bs = jax.random.uniform(ks[7], (1, num_actions), jnp.float32, -init_w, init_w)

    # fused head padded to a lane-dense width: [0:A)=mean, [A:2A)=log_std, rest 0
    head_width = _round_up(max(2 * num_actions, 128), 128)
    wh = jnp.zeros((h2, head_width), jnp.float32)
    wh = wh.at[:, :num_actions].set(wm).at[:, num_actions:2 * num_actions].set(ws)
    bh = jnp.zeros((1, head_width), jnp.float32)
    bh = bh.at[:, :num_actions].set(bm[0]).at[:, num_actions:2 * num_actions].set(bs[0])

    return dict(
        # matmul weights stored bf16 (halves HBM->VMEM bytes; MXU-native)
        w1=w1.astype(jnp.bfloat16), b1=b1,
        w2=w2.astype(jnp.bfloat16), b2=b2,
        wh=wh.astype(jnp.bfloat16), bh=bh,
    )


def policy_forward(state, params, num_actions, *, block_b=512):
    """Returns (mean, log_std) — matches PolicyNetwork.forward."""
    x = state.astype(jnp.bfloat16)       # halve the per-tile activation DMA
    B, D = x.shape
    w1, b1 = params["w1"], params["b1"]
    w2, b2 = params["w2"], params["b2"]
    wh, bh = params["wh"], params["bh"]
    H1, H2 = w1.shape[1], w2.shape[1]
    HW = wh.shape[1]
    A = num_actions

    # batch tiling: no host-side padding — ragged final block handled by Pallas.
    if B <= block_b:
        tb = _round_up(B, 8)
    else:
        n_tiles = -(-B // block_b)
        if n_tiles % 2:
            n_tiles += 1                  # even grid -> both v7x TensorCores busy
        tb = _round_up(-(-B // n_tiles), 8)
    grid = (pl.cdiv(B, tb),)

    flops = 2 * B * (D * H1 + H1 * H2 + H2 * HW)
    bytes_accessed = (B * D * 2 + (w1.size + w2.size + wh.size) * 2
                      + (b1.size + b2.size + bh.size) * 4 + B * HW * 4)

    kernel = functools.partial(policy_kernel, num_actions=A)

    heads = pl.pallas_call(
        kernel,
        out_shape=jax.ShapeDtypeStruct((B, HW), jnp.float32),
        grid=grid,
        in_specs=[
            pl.BlockSpec((tb, D), lambda i: (i, 0)),       # activations: tiled
            pl.BlockSpec((D, H1), lambda i: (0, 0)),       # weights: VMEM-resident
            pl.BlockSpec((1, H1), lambda i: (0, 0)),
            pl.BlockSpec((H1, H2), lambda i: (0, 0)),
            pl.BlockSpec((1, H2), lambda i: (0, 0)),
            pl.BlockSpec((H2, HW), lambda i: (0, 0)),
            pl.BlockSpec((1, HW), lambda i: (0, 0)),
        ],
        out_specs=pl.BlockSpec((tb, HW), lambda i: (i, 0)),
        compiler_params=pltpu.CompilerParams(
            dimension_semantics=("parallel",)),
        cost_estimate=pl.CostEstimate(
            flops=int(flops), transcendentals=0,
            bytes_accessed=int(bytes_accessed)),
    )(x, w1, b1, w2, b2, wh, bh)

    return heads[:, :A], heads[:, A:2 * A]


def policy_reference(state, params, num_actions):
    """Pure-JAX reference with the same bf16-matmul / f32-accumulate numerics."""
    x = state.astype(jnp.bfloat16)
    h = jnp.maximum(jnp.dot(x, params["w1"],
                            preferred_element_type=jnp.float32) + params["b1"], 0.0)
    h = jnp.maximum(jnp.dot(h.astype(jnp.bfloat16), params["w2"],
                            preferred_element_type=jnp.float32) + params["b2"], 0.0)
    heads = jnp.dot(h.astype(jnp.bfloat16), params["wh"],
                    preferred_element_type=jnp.float32) + params["bh"]
    A = num_actions
    mean = heads[:, :A]
    log_std = jnp.clip(heads[:, A:2 * A], LOG_STD_MIN, LOG_STD_MAX)
    return mean, log_std


# TODO(synk): PolicyNetwork.sample() (Normal.rsample, tanh squashing, log_prob)
# is not part of forward(); it is left to plain JAX outside the kernel.

if __name__ == "__main__":
    NUM_INPUTS, NUM_ACTIONS = 32, 8
    HIDDEN = (400, 300)  # module default hidden_dim

    key = jax.random.PRNGKey(0)
    k_state, k_state2, k_params = jax.random.split(key, 3)
    params = init_params(k_params, NUM_INPUTS, NUM_ACTIONS, HIDDEN)

    # small batch (single-tile path)
    state = jax.random.normal(k_state, (8, NUM_INPUTS), jnp.float32)
    mean, log_std = policy_forward(state, params, NUM_ACTIONS)
    mean, log_std = jax.block_until_ready((mean, log_std))
    mean_r, log_std_r = policy_reference(state, params, NUM_ACTIONS)
    assert mean.shape == (8, NUM_ACTIONS) and log_std.shape == (8, NUM_ACTIONS)
    assert jnp.allclose(mean, mean_r, atol=5e-3, rtol=5e-3), "mean mismatch"
    assert jnp.allclose(log_std, log_std_r, atol=5e-3, rtol=5e-3), "log_std mismatch"

    # larger batch: exercises multi-tile grid, even-tile balancing and the
    # ragged (non-divisible) final block without any host-side pad/slice.
    state2 = jax.random.normal(k_state2, (600, NUM_INPUTS), jnp.float32)
    mean2, log_std2 = policy_forward(state2, params, NUM_ACTIONS, block_b=512)
    mean2, log_std2 = jax.block_until_ready((mean2, log_std2))
    mean2_r, log_std2_r = policy_reference(state2, params, NUM_ACTIONS)
    assert jnp.allclose(mean2, mean2_r, atol=5e-3, rtol=5e-3), "mean mismatch (tiled)"
    assert jnp.allclose(log_std2, log_std2_r, atol=5e-3, rtol=5e-3), "log_std mismatch (tiled)"

    # small block_b forces an odd->even tile-count bump and a ragged tail tile
    mean3, log_std3 = policy_forward(state2, params, NUM_ACTIONS, block_b=256)
    mean3, log_std3 = jax.block_until_ready((mean3, log_std3))
    assert jnp.allclose(mean3, mean2_r, atol=5e-3, rtol=5e-3), "mean mismatch (ragged)"
    assert jnp.allclose(log_std3, log_std2_r, atol=5e-3, rtol=5e-3), "log_std mismatch (ragged)"

    print("KERNEL_OK")
</pallas_src>

<mosaic_0001>
module attributes {stable_mosaic.version = 11 : i64} {
  func.func @policy_kernel(%arg0: i32, %arg1: memref<8x32xbf16, #tpu.memory_space<vmem>>, %arg2: memref<32x400xbf16, #tpu.memory_space<vmem>>, %arg3: memref<1x400xf32, #tpu.memory_space<vmem>>, %arg4: memref<400x300xbf16, #tpu.memory_space<vmem>>, %arg5: memref<1x300xf32, #tpu.memory_space<vmem>>, %arg6: memref<300x128xbf16, #tpu.memory_space<vmem>>, %arg7: memref<1x128xf32, #tpu.memory_space<vmem>>, %arg8: memref<8x128xf32, #tpu.memory_space<vmem>>) attributes {dimension_semantics = [#tpu.dimension_semantics<parallel>], iteration_bounds = array<i64: 1>, scalar_prefetch = 0 : i64, scratch_operands = 0 : i64, tpu.core_type = #tpu.core_type<tc>, window_params = [{transform_indices = @transform_0, window_bounds = array<i64: 8, 32>}, {pipeline_mode = #tpu.pipeline_mode<synchronous>, transform_indices = @transform_1, window_bounds = array<i64: 32, 400>}, {pipeline_mode = #tpu.pipeline_mode<synchronous>, transform_indices = @transform_2, window_bounds = array<i64: 1, 400>}, {pipeline_mode = #tpu.pipeline_mode<synchronous>, transform_indices = @transform_3, window_bounds = array<i64: 400, 300>}, {pipeline_mode = #tpu.pipeline_mode<synchronous>, transform_indices = @transform_4, window_bounds = array<i64: 1, 300>}, {pipeline_mode = #tpu.pipeline_mode<synchronous>, transform_indices = @transform_5, window_bounds = array<i64: 300, 128>}, {pipeline_mode = #tpu.pipeline_mode<synchronous>, transform_indices = @transform_6, window_bounds = array<i64: 1, 128>}, {transform_indices = @transform_7, window_bounds = array<i64: 8, 128>}]} {
    %c0 = arith.constant 0 : index
    %c0_0 = arith.constant 0 : index
    %0 = vector.load %arg1[%c0, %c0_0] : memref<8x32xbf16, #tpu.memory_space<vmem>>, vector<8x32xbf16>
    %c0_1 = arith.constant 0 : index
    %c0_2 = arith.constant 0 : index
    %1 = vector.load %arg2[%c0_1, %c0_2] : memref<32x400xbf16, #tpu.memory_space<vmem>>, vector<32x400xbf16>
    %cst = arith.constant dense<0.000000e+00> : vector<8x400xf32>
    %2 = tpu.matmul %0, %1, %cst {dimension_numbers = #tpu.dot_dimension_numbers<[1], [0], [0], [1], [0, 0, 1, 1], [], []>} : vector<8x32xbf16>, vector<32x400xbf16>, vector<8x400xf32> -> vector<8x400xf32>
    %c0_3 = arith.constant 0 : index
    %c0_4 = arith.constant 0 : index
    %3 = vector.load %arg3[%c0_3, %c0_4] : memref<1x400xf32, #tpu.memory_space<vmem>>, vector<1x400xf32>
    %4 = vector.broadcast %3 : vector<1x400xf32> to vector<8x400xf32>
    %5 = arith.addf %2, %4 : vector<8x400xf32>
    %cst_5 = arith.constant 0.000000e+00 : f32
    %6 = vector.broadcast %cst_5 : f32 to vector<8x400xf32>
    %7 = arith.maximumf %5, %6 : vector<8x400xf32>
    %8 = arith.truncf %7 : vector<8x400xf32> to vector<8x400xbf16>
    %c0_6 = arith.constant 0 : index
    %c0_7 = arith.constant 0 : index
    %9 = vector.load %arg4[%c0_6, %c0_7] : memref<400x300xbf16, #tpu.memory_space<vmem>>, vector<400x300xbf16>
    %cst_8 = arith.constant dense<0.000000e+00> : vector<8x300xf32>
    %10 = tpu.matmul %8, %9, %cst_8 {dimension_numbers = #tpu.dot_dimension_numbers<[1], [0], [0], [1], [0, 0, 1, 1], [], []>} : vector<8x400xbf16>, vector<400x300xbf16>, vector<8x300xf32> -> vector<8x300xf32>
    %c0_9 = arith.constant 0 : index
    %c0_10 = arith.constant 0 : index
    %11 = vector.load %arg5[%c0_9, %c0_10] : memref<1x300xf32, #tpu.memory_space<vmem>>, vector<1x300xf32>
    %12 = vector.broadcast %11 : vector<1x300xf32> to vector<8x300xf32>
    %13 = arith.addf %10, %12 : vector<8x300xf32>
    %cst_11 = arith.constant 0.000000e+00 : f32
    %14 = vector.broadcast %cst_11 : f32 to vector<8x300xf32>
    %15 = arith.maximumf %13, %14 : vector<8x300xf32>
    %16 = arith.truncf %15 : vector<8x300xf32> to vector<8x300xbf16>
    %c0_12 = arith.constant 0 : index
    %c0_13 = arith.constant 0 : index
    %17 = vector.load %arg6[%c0_12, %c0_13] : memref<300x128xbf16, #tpu.memory_space<vmem>>, vector<300x128xbf16>
    %cst_14 = arith.constant dense<0.000000e+00> : vector<8x128xf32>
    %18 = tpu.matmul %16, %17, %cst_14 {dimension_numbers = #tpu.dot_dimension_numbers<[1], [0], [0], [1], [0, 0, 1, 1], [], []>} : vector<8x300xbf16>, vector<300x128xbf16>, vector<8x128xf32> -> vector<8x128xf32>
    %c0_15 = arith.constant 0 : index
    %c0_16 = arith.constant 0 : index
    %19 = vector.load %arg7[%c0_15, %c0_16] : memref<1x128xf32, #tpu.memory_space<vmem>>, vector<1x128xf32>
    %20 = vector.broadcast %19 : vector<1x128xf32> to vector<8x128xf32>
    %21 = arith.addf %18, %20 : vector<8x128xf32>
    %22 = tpu.iota {dimensions = array<i32: 1>} : vector<8x128xi32>
    %cst_17 = arith.constant -2.000000e+01 : f32
    %cst_18 = arith.constant 2.000000e+00 : f32
    %23 = vector.broadcast %cst_17 : f32 to vector<8x128xf32>
    %24 = arith.maximumf %23, %21 : vector<8x128xf32>
    %25 = vector.broadcast %cst_18 : f32 to vector<8x128xf32>
    %26 = arith.minimumf %25, %24 : vector<8x128xf32>
    %c8_i32 = arith.constant 8 : i32
    %27 = vector.broadcast %c8_i32 : i32 to vector<8x128xi32>
    %28 = arith.cmpi sge, %22, %27 : vector<8x128xi32>
    %29 = arith.select %28, %26, %21 : vector<8x128xi1>, vector<8x128xf32>
    %c0_19 = arith.constant 0 : index
    %c0_20 = arith.constant 0 : index
    %30 = vector.load %arg8[%c0_19, %c0_20] : memref<8x128xf32, #tpu.memory_space<vmem>>, vector<8x128xf32>
    tpu.vector_store %arg8[%c0_19, %c0_20], %29 {strides = array<i32>} : memref<8x128xf32, #tpu.memory_space<vmem>>, vector<8x128xf32>,
    return
  }
  func.func @transform_0(%arg0: i32) -> (i32, i32) {
    %c0_i32 = arith.constant 0 : i32
    %c0_i32_0 = arith.constant 0 : i32
    return %arg0, %c0_i32 : i32, i32
  }
  func.func @transform_1(%arg0: i32) -> (i32, i32) {
    %c0_i32 = arith.constant 0 : i32
    %c0_i32_0 = arith.constant 0 : i32
    %c0_i32_1 = arith.constant 0 : i32
    return %c0_i32, %c0_i32_0 : i32, i32
  }
  func.func @transform_2(%arg0: i32) -> (i32, i32) {
    %c0_i32 = arith.constant 0 : i32
    %c0_i32_0 = arith.constant 0 : i32
    %c0_i32_1 = arith.constant 0 : i32
    return %c0_i32, %c0_i32_0 : i32, i32
  }
  func.func @transform_3(%arg0: i32) -> (i32, i32) {
    %c0_i32 = arith.constant 0 : i32
    %c0_i32_0 = arith.constant 0 : i32
    %c0_i32_1 = arith.constant 0 : i32
    return %c0_i32, %c0_i32_0 : i32, i32
  }
  func.func @transform_4(%arg0: i32) -> (i32, i32) {
    %c0_i32 = arith.constant 0 : i32
    %c0_i32_0 = arith.constant 0 : i32
    %c0_i32_1 = arith.constant 0 : i32
    return %c0_i32, %c0_i32_0 : i32, i32
  }
  func.func @transform_5(%arg0: i32) -> (i32, i32) {
    %c0_i32 = arith.constant 0 : i32
    %c0_i32_0 = arith.constant 0 : i32
    %c0_i32_1 = arith.constant 0 : i32
    return %c0_i32, %c0_i32_0 : i32, i32
  }
  func.func @transform_6(%arg0: i32) -> (i32, i32) {
    %c0_i32 = arith.constant 0 : i32
    %c0_i32_0 = arith.constant 0 : i32
    %c0_i32_1 = arith.constant 0 : i32
    return %c0_i32, %c0_i32_0 : i32, i32
  }
  func.func @transform_7(%arg0: i32) -> (i32, i32) {
    %c0_i32 = arith.constant 0 : i32
    %c0_i32_0 = arith.constant 0 : i32
    return %arg0, %c0_i32 : i32, i32
  }
}

</mosaic_0001>

<bundles_post_ra>
// kernel: tpu_custom_call.1
= control target key start
LH: loop header
LB: loop body
LE: loop exit
PB: predicated region body
PF: predicated region fallthrough
CT: control target
= control target key end

     0   :  { %12 = vsyncpa [#allocation3], 0  ;;  %s1772_s0 = inlined_call_operand.hbm [shape: bf16[8,32], index: 0, kind: input, shape index: {}]   ;;  %s1773_s1 = inlined_call_operand.hbm [shape: bf16[32,400], index: 1, kind: input, shape index: {}]   ;;  %s1774_s2 = inlined_call_operand.hbm [shape: f32[1,400], index: 2, kind: input, shape index: {}]   ;;  %s1775_s3 = inlined_call_operand.hbm [shape: bf16[400,300], index: 3, kind: input, shape index: {}]   ;;  %s1776_s4 = inlined_call_operand.vmem [shape: f32[1,300], index: 4, kind: input, shape index: {}]   ;;  %s1777_s5 = inlined_call_operand.hbm [shape: bf16[300,128], index: 5, kind: input, shape index: {}]   ;;  %s1778_s6 = inlined_call_operand.vmem [shape: f32[1,128], index: 6, kind: input, shape index: {}]   ;;  %s1779_s7 = inlined_call_operand.hbm [shape: f32[8,128], index: 7, kind: output, shape index: {}]  }
   0x1   :  { %13 = vsyncpa [#allocation6], 0 }
   0x2   :  { %14 = vsyncpa [#allocation9], 0 }
   0x3   :  { %15 = vsyncpa [#allocation4], 0  ;;  %s1656_s24 = smov [#allocation5]  }
   0x4   :  { %s31_s25 = sshll.u32 %s1656_s24, 4  ;;  %s32_s25 = int_to_ptr.vmem [resolvable:$true] %s31_s25 }
   0x5   :  { %s1536_s26 = scalar_lea.vmem %s32_s25, 1024  ;;  %p1541_p1 = scmp.lt.s32.totalorder %s32_s25, %s32_s25 }
   0x6   :  { %p1537_p0 = scmp.ne.s32.totalorder %s32_s25, %s1536_s26  ;;  %p1542_p2 = scmp.lt.s32.totalorder %s1536_s26, %s1536_s26 }
   0x8   :  { %p1543_p3 = por %p1542_p2, %p1541_p1 }
   0xa   :  { %p1544_p4 = pnand %p1543_p3, %p1537_p0 }
   0xc   :  { %1547 = shalt.err (!%p1544_p4)
}
   0xd   :  { %s1657_s27 = smov 256   ;;  %s1658_s28 = smov 16  }
   0xe   :  { %37 = dma.hbm_to_vmem [thread:$0]  %s1773_s1, 1024, %s32_s25, [#allocation6], %s1657_s27, %s1657_s27, %s1658_s28  }
   0xf   :  { %s1659_s8 = smov [#allocation8]  }
  0x10   :  { %s53_s9 = sshll.u32 %s1659_s8, 4  ;;  %s54_s9 = int_to_ptr.vmem [resolvable:$true] %s53_s9 }
  0x11   :  { %s1556_s10 = scalar_lea.vmem %s54_s9, 9600  ;;  %p1561_p6 = scmp.lt.s32.totalorder %s54_s9, %s54_s9 }
  0x12   :  { %p1557_p5 = scmp.ne.s32.totalorder %s54_s9, %s1556_s10  ;;  %p1562_p7 = scmp.lt.s32.totalorder %s1556_s10, %s1556_s10 }
  0x14   :  { %p1563_p8 = por %p1562_p7, %p1561_p6 }
  0x16   :  { %p1564_p9 = pnand %p1563_p8, %p1557_p5 }
  0x18   :  { %1567 = shalt.err (!%p1564_p9)
}
  0x19   :  { %s1660_s11 = smov 192   ;;  %s1661_s12 = smov 12  }
  0x1a   :  { %59 = dma.hbm_to_vmem [thread:$0]  %s1775_s3, 9600, %s54_s9, [#allocation9], %s1660_s11, %s1660_s11, %s1661_s12  }
  0x1b   :  { %s1662_s15 = smov [#allocation2]   ;;  %s1663_s17 = smov [#allocation7]  }
  0x1c   :  { %s22_s16 = sshll.u32 %s1662_s15, 4  ;;  %s44_s1 = sshll.u32 %s1663_s17, 4  ;;  %s23_s16 = int_to_ptr.vmem [resolvable:$true] %s22_s16  ;;  %s45_s1 = int_to_ptr.vmem [resolvable:$true] %s44_s1 }
  0x1d   :  { %s1576_s18 = scalar_lea.vmem %s23_s16, 64  ;;  %p1581_p11 = scmp.lt.s32.totalorder %s23_s16, %s23_s16 }
  0x1e   :  { %p1577_p10 = scmp.ne.s32.totalorder %s23_s16, %s1576_s18  ;;  %p1582_p12 = scmp.lt.s32.totalorder %s1576_s18, %s1576_s18 }
  0x20   :  { %p1583_p13 = por %p1582_p12, %p1581_p11 }
  0x22   :  { %p1584_p0 = pnand %p1583_p13, %p1577_p10 }
  0x24   :  { %1587 = shalt.err (!%p1584_p0)
}
  0x25   :  { %25 = dma.hbm_to_vmem [thread:$0]  %s1772_s0, 64, %s23_s16, [#allocation3]  }
  0x26   :  { %s1596_s21 = scalar_lea.vmem %s45_s1, 64  ;;  %p1601_p2 = scmp.lt.s32.totalorder %s45_s1, %s45_s1 }
  0x27   :  { %p1597_p1 = scmp.ne.s32.totalorder %s45_s1, %s1596_s21  ;;  %p1602_p3 = scmp.lt.s32.totalorder %s1596_s21, %s1596_s21 }
  0x29   :  { %p1603_p4 = por %p1602_p3, %p1601_p2 }
  0x2b   :  { %p1604_p5 = pnand %p1603_p4, %p1597_p1 }
  0x2d   :  { %1607 = shalt.err (!%p1604_p5)
}
  0x2e   :  { %47 = dma.hbm_to_vmem [thread:$0]  %s1774_s2, 64, %s45_s1, [#allocation6]  }
  0x2f   :  { %s1664_s23 = smov [#allocation10]  }
  0x30   :  { %s67_s24 = sshll.u32 %s1664_s23, 4  ;;  %s68_s24 = int_to_ptr.vmem [resolvable:$true] %s67_s24 }
  0x31   :  { %s1616_s25 = scalar_lea.vmem %s68_s24, 2432  ;;  %p1621_p7 = scmp.lt.s32.totalorder %s68_s24, %s68_s24 }
  0x32   :  { %p1617_p6 = scmp.ne.s32.totalorder %s68_s24, %s1616_s25  ;;  %p1622_p8 = scmp.lt.s32.totalorder %s1616_s25, %s1616_s25 }
  0x34   :  { %p1623_p9 = por %p1622_p8, %p1621_p7 }
  0x36   :  { %p1624_p10 = pnand %p1623_p9, %p1617_p6 }
  0x38   :  { %1627 = shalt.err (!%p1624_p10)
}
  0x39   :  { %s1665_s0 = smov 64   ;;  %s1666_s26 = smov 4  }
  0x3a   :  { %73 = dma.hbm_to_vmem [thread:$0]  %s1777_s5, 2432, %s68_s24, [#allocation9], %s1665_s0, %s1665_s0, %s1666_s26  }
  0x3b   :  { %1648 = dma.done.wait [#allocation3], 64  }
  0x3c   :  { %1649 = vsyncadd [#allocation3], 4294967232 }
  0x3d   :  { %1650 = dma.done.wait [#allocation6], 1088  }
  0x3e   :  { %1651 = vsyncadd [#allocation6], 4294966208 }
  0x3f   :  { %1652 = dma.done.wait [#allocation9], 12032  }
  0x40   :  { %1653 = vsyncadd [#allocation9], 4294955264  ;;  %v1667_v0 = vmov 0   ;;  %v1397_v1 = vld [vmem:[#allocation5 + $0x24] ss:$16 sps:$4 sm:$0xff]   ;;  %vm163_vm0 = vcmask 261120   ;;  %v103_v61 = vlaneseq }
  0x41   :  { %199 = vmatprep.mubr.bf16.mxu1 %v1667_v0  ;;  %v1399_v2 = vld [vmem:[#allocation5 + $0x20] ss:$16 sps:$4 sm:$0xff]   ;;  %179 = vmatprep.subr.bf16.mxu1 %v1397_v1  ;;  %v1400_v3 = vld [vmem:[#allocation5 + $0x4] ss:$16 sps:$4 sm:$0xff]   ;;  %v1405_v5 = vld [vmem:[#allocation5 + $0x2c] ss:$16 sps:$4 sm:$0xff]  }
  0x42   :  { %180 = vmatpush1.bf16.msra.mxu1 %v1399_v2  ;;  %v1402_v4 = vld [vmem:[#allocation5] ss:$16 sps:$4 sm:$0xff]   ;;  %v92_v6 = vld [vmem:[#allocation2] sm:$0xf]  ;;  %v1403_v7 = vld [vmem:[#allocation5 + $0x28] ss:$16 sps:$4 sm:$0xff]  }
  0x43   :  { %181 = vmatprep.subr.bf16.mxu1 %v1400_v3  ;;  %v1409_v8 = vld [vmem:[#allocation8 + $0xac] ss:$12 sps:$4 sm:$0xff]   ;;  %v1411_v9 = vld [vmem:[#allocation8 + $0xa8] ss:$12 sps:$4 sm:$0xff]   ;;  %v1414_v12 = vld [vmem:[#allocation8 + $0x90] ss:$12 sps:$4 sm:$0xff]  }
  0x44   :  { %v1412_v10 = vld [vmem:[#allocation8 + $0x94] ss:$12 sps:$4 sm:$0xff]   ;;  %v1408_v11 = vld [vmem:[#allocation5 + $0xc] ss:$16 sps:$4 sm:$0xff]   ;;  %778 = vmatprep.subr.bf16.mxu0 %v1409_v8  ;;  %v1418_v16 = vld [vmem:[#allocation8 + $0x64] ss:$12 sps:$4 sm:$0xff]  }
  0x45   :  { %779 = vmatpush1.bf16.msra.mxu0 %v1411_v9  ;;  %v1415_v13 = vld [vmem:[#allocation8 + $0x7c] ss:$12 sps:$4 sm:$0xff]   ;;  %v1406_v14 = vld [vmem:[#allocation5 + $0x8] ss:$16 sps:$4 sm:$0xff]   ;;  %v1420_v17 = vld [vmem:[#allocation8 + $0x60] ss:$12 sps:$4 sm:$0xff]  }
  0x46   :  { %182 = vmatpush1.bf16.msra.mxu1 %v1402_v4  ;;  %780 = vmatprep.subr.bf16.mxu0 %v1412_v10  ;;  %v1417_v15 = vld [vmem:[#allocation8 + $0x78] ss:$12 sps:$4 sm:$0xff]   ;;  %v1438_v19 = vld [vmem:[#allocation8 + $0x228] ss:$12 sps:$4 sm:$0xff]   ;;  %v1444_v23 = vld [vmem:[#allocation8 + $0x210] ss:$12 sps:$4 sm:$0xff]  }
  0x47   :  { %220 = vmatprep.subr.bf16.mxu1 %v1405_v5  ;;  %v1421_v18 = vld [vmem:[#allocation8 + $0x4c] ss:$12 sps:$4 sm:$0xff]   ;;  %v1423_v21 = vld [vmem:[#allocation8 + $0x48] ss:$12 sps:$4 sm:$0xff]   ;;  %v1426_v25 = vld [vmem:[#allocation8 + $0x30] ss:$12 sps:$4 sm:$0xff]  }
  0x48   :  { %v1440_v20 = vld [vmem:[#allocation8 + $0x22c] ss:$12 sps:$4 sm:$0xff]   ;;  %v1424_v22 = vld [vmem:[#allocation8 + $0x34] ss:$12 sps:$4 sm:$0xff]   ;;  %v1427_v26 = vld [vmem:[#allocation8 + $0x1c] ss:$12 sps:$4 sm:$0xff]  }
  0x49   :  { %1224 = vmatmul.mubr.msk.bf16.vlgmr.msra.gmra.mxu1 %vm163_vm0, %v92_v6  ;;  %781 = vmatpush1.bf16.msra.mxu0 %v1414_v12  ;;  %v1446_v24 = vld [vmem:[#allocation8 + $0x214] ss:$12 sps:$4 sm:$0xff]   ;;  %v1452_v27 = vld [vmem:[#allocation8 + $0x1fc] ss:$12 sps:$4 sm:$0xff]   ;;  %v1450_v28 = vld [vmem:[#allocation8 + $0x1f8] ss:$12 sps:$4 sm:$0xff]  }
  0x4a   :  { %221 = vmatpush1.bf16.msra.mxu1 %v1403_v7  ;;  %240 = vmatprep.mubr.bf16.mxu1 %v1667_v0  ;;  %v1458_v29 = vld [vmem:[#allocation8 + $0x1e4] ss:$12 sps:$4 sm:$0xff]   ;;  %v1456_v32 = vld [vmem:[#allocation8 + $0x1e0] ss:$12 sps:$4 sm:$0xff]   ;;  %v1462_v36 = vld [vmem:[#allocation8 + $0x1c8] ss:$12 sps:$4 sm:$0xff]  }
  0x4b   :  { %222 = vmatprep.subr.bf16.mxu1 %v1408_v11  ;;  %782 = vmatprep.subr.bf16.mxu0 %v1415_v13  ;;  %v1429_v30 = vld [vmem:[#allocation8 + $0x18] ss:$12 sps:$4 sm:$0xff]   ;;  %v1432_v33 = vld [vmem:[#allocation8] ss:$12 sps:$4 sm:$0xff]   ;;  %v1435_v37 = vld [vmem:[#allocation8 + $0x168] ss:$12 sps:$4 sm:$0xff]  }
  0x4c   :  { %v1430_v31 = vld [vmem:[#allocation8 + $0x4] ss:$12 sps:$4 sm:$0xff]   ;;  %v1464_v34 = vld [vmem:[#allocation8 + $0x1cc] ss:$12 sps:$4 sm:$0xff]   ;;  %v1436_v38 = vld [vmem:[#allocation8 + $0x154] ss:$12 sps:$4 sm:$0xff]  }
  0x4d   :  { %783 = vmatpush1.bf16.msra.mxu0 %v1417_v15  ;;  %v1433_v35 = vld [vmem:[#allocation8 + $0x16c] ss:$12 sps:$4 sm:$0xff]   ;;  %v1441_v39 = vld [vmem:[#allocation8 + $0x150] ss:$12 sps:$4 sm:$0xff]   ;;  %v1459_v45 = vld [vmem:[#allocation8 + $0x108] ss:$12 sps:$4 sm:$0xff]  }
  0x4e   :  { %223 = vmatpush1.bf16.msra.mxu1 %v1406_v14  ;;  %784 = vmatprep.subr.bf16.mxu0 %v1418_v16  ;;  %v1442_v40 = vld [vmem:[#allocation8 + $0x13c] ss:$12 sps:$4 sm:$0xff]   ;;  %v1447_v41 = vld [vmem:[#allocation8 + $0x138] ss:$12 sps:$4 sm:$0xff]   ;;  %v1453_v43 = vld [vmem:[#allocation8 + $0x120] ss:$12 sps:$4 sm:$0xff]  }
  0x4f   :  { %819 = vmatprep.subr.bf16.mxu1 %v1440_v20  ;;  %v1448_v42 = vld [vmem:[#allocation8 + $0x124] ss:$12 sps:$4 sm:$0xff]   ;;  %v1454_v44 = vld [vmem:[#allocation8 + $0x10c] ss:$12 sps:$4 sm:$0xff]   ;;  %v1460_v46 = vld [vmem:[#allocation8 + $0xf4] ss:$12 sps:$4 sm:$0xff]  }
  0x50   :  { %v1465_v47 = vld [vmem:[#allocation8 + $0xf0] ss:$12 sps:$4 sm:$0xff]   ;;  %v1470_v49 = vld [vmem:[#allocation8 + $0x1b4] ss:$12 sps:$4 sm:$0xff]   ;;  %v1471_v51 = vld [vmem:[#allocation8 + $0xd8] ss:$12 sps:$4 sm:$0xff]  }
  0x51   :  { %1225 = vmatmul.mubr.msk.bf16.vlgmr.msra.gmra.mxu1 %vm163_vm0, %v92_v6  ;;  %785 = vmatpush1.bf16.msra.mxu0 %v1420_v17  ;;  %v1466_v48 = vld [vmem:[#allocation8 + $0xdc] ss:$12 sps:$4 sm:$0xff]   ;;  %v1472_v52 = vld [vmem:[#allocation8 + $0xc4] ss:$12 sps:$4 sm:$0xff]   ;;  %v1477_v55 = vld [vmem:[#allocation8 + $0xc0] ss:$12 sps:$4 sm:$0xff]  }
  0x52   :  { %786 = vmatprep.subr.bf16.mxu0 %v1421_v18  ;;  %820 = vmatpush1.bf16.msra.mxu1 %v1438_v19  ;;  %v1468_v50 = vld [vmem:[#allocation8 + $0x1b0] ss:$12 sps:$4 sm:$0xff]   ;;  %v1474_v54 = vld [vmem:[#allocation8 + $0x198] ss:$12 sps:$4 sm:$0xff]   ;;  %v1478_v57 = vld [vmem:[#allocation8 + $0x180] ss:$12 sps:$4 sm:$0xff]  }
  0x53   :  { %821 = vmatprep.subr.bf16.mxu1 %v1446_v24  ;;  %v1476_v53 = vld [vmem:[#allocation8 + $0x19c] ss:$12 sps:$4 sm:$0xff]   ;;  %v1480_v56 = vld [vmem:[#allocation8 + $0x184] ss:$12 sps:$4 sm:$0xff]   ;;  %v1482_v59 = vld [vmem:[#allocation8 + $0x240] ss:$12 sps:$4 sm:$0xff]  }
  0x54   :  { %v1484_v58 = vld [vmem:[#allocation8 + $0x244] ss:$12 sps:$4 sm:$0xff]   ;;  %v1732_v62 = vshrl.u32 %v103_v61, 7  ;;  %v101_v1 = vld [vmem:[#allocation7] sm:$0xf]  ;;  %vm774_vm1 = vcmask 130048  }
  0x55   :  { %787 = vmatpush1.bf16.msra.mxu0 %v1423_v21  ;;  %v1486_v60 = vld [vmem:[#allocation8 + $0x170] ss:$12 sps:$4 sm:$0xff]   ;;  %v1485_v24 = vld [vmem:[#allocation8 + $0x218] ss:$12 sps:$4 sm:$0xff]   ;;  %vm1108_vm2 = vcmask 1045504   ;;  %vm1669_vm3 = vmmov 0  }
  0x56   :  { %788 = vmatprep.subr.bf16.mxu0 %v1424_v22  ;;  %822 = vmatpush1.bf16.msra.mxu1 %v1444_v23  ;;  %v105_v63 = vsub.s32 0, %v1732_v62  ;;  %v109_v2 = vsub.s32 1, %v1732_v62  ;;  %v113_v7 = vsub.s32 2, %v1732_v62  ;;  %v117_v10 = vsub.s32 3, %v1732_v62  ;;  %v1481_v18 = vld [vmem:[#allocation8 + $0x230] ss:$12 sps:$4 sm:$0xff]  }
  0x57   :  { %823 = vmatprep.subr.bf16.mxu1 %v1452_v27  ;;  %vm1104_vm4 = vcmask 359424   ;;  %v1303_v62 = vld [vmem:[%s1778_s6] ss:$0 sm:$0xff]  ;;  %s1670_s30 = smov [#allocation11]  }
  0x58   :  { %v106_v3 = vrot.slane %v101_v1, %v105_v63  ;;  %v110_v4 = vrot.slane %v101_v1, %v109_v2  ;;  %v114_v14 = vrot.slane %v101_v1, %v113_v7  ;;  %v118_v17 = vrot.slane %v101_v1, %v117_v10  ;;  %v1518_v1 = vld [vmem:[#allocation10 + $0x18] sm:$0xff]   ;;  %v1525_v10 = vld [vmem:[#allocation10 + $0x90] sm:$0x3f]   ;;  %s1205_s8 = sshll.u32 %s1670_s30, 4  ;;  %s1206_s8 = int_to_ptr.vmem [resolvable:$true] %s1205_s8 }
  0x59   :  { %789 = vmatpush1.bf16.msra.mxu0 %v1426_v25  ;;  %s1628_s9 = scalar_lea.vmem %s1206_s8, 128  ;;  %p1633_p12 = scmp.lt.s32.totalorder %s1206_s8, %s1206_s8 }
  0x5a   :  { %790 = vmatprep.subr.bf16.mxu0 %v1427_v26  ;;  %824 = vmatpush1.bf16.msra.mxu1 %v1450_v28  ;;  %p1629_p11 = scmp.ne.s32.totalorder %s1206_s8, %s1628_s9  ;;  %p1634_p13 = scmp.lt.s32.totalorder %s1628_s9, %s1628_s9 }
  0x5b   :  { %825 = vmatprep.subr.bf16.mxu1 %v1458_v29 }
  0x5c   :  { %p1635_p0 = por %p1634_p13, %p1633_p12 }
  0x5d   :  { %791 = vmatpush1.bf16.msra.mxu0 %v1429_v30  ;;  %v1487_v30 = vld [vmem:[#allocation8 + $0xb0] ss:$12 sps:$4 sm:$0xff]  }
  0x5e   :  { %792 = vmatprep.subr.bf16.mxu0 %v1430_v31  ;;  %826 = vmatpush1.bf16.msra.mxu1 %v1456_v32  ;;  %v1488_v31 = vld [vmem:[#allocation8 + $0x200] ss:$12 sps:$4 sm:$0xff]   ;;  %p1636_p1 = pnand %p1635_p0, %p1629_p11 }
  0x5f   :  { %827 = vmatprep.subr.bf16.mxu1 %v1464_v34  ;;  %v1490_v34 = vld [vmem:[#allocation8 + $0x98] ss:$12 sps:$4 sm:$0xff]  }
  0x61   :  { %793 = vmatpush1.bf16.msra.mxu0 %v1432_v33  ;;  %v1489_v33 = vld [vmem:[#allocation8 + $0x158] ss:$12 sps:$4 sm:$0xff]  }
  0x62   :  { %794 = vmatprep.subr.bf16.mxu0 %v1433_v35  ;;  %828 = vmatpush1.bf16.msra.mxu1 %v1462_v36  ;;  %v1491_v35 = vld [vmem:[#allocation8 + $0x1e8] ss:$12 sps:$4 sm:$0xff]   ;;  %v1492_v36 = vld [vmem:[#allocation8 + $0x140] ss:$12 sps:$4 sm:$0xff]  }
  0x63   :  { %829 = vmatprep.subr.bf16.mxu1 %v1470_v49  ;;  %v1505_v49 = vld [vmem:[#allocation8 + $0x20] ss:$12 sps:$4 sm:$0xff]  }
  0x65   :  { %795 = vmatpush2.bf16.msra.mxu0 %v1435_v37  ;;  %v1493_v37 = vld [vmem:[#allocation8 + $0x80] ss:$12 sps:$4 sm:$0xff]  }
  0x66   :  { %796 = vmatprep.subr.bf16.mxu0 %v1436_v38  ;;  %830 = vmatpush1.bf16.msra.mxu1 %v1468_v50  ;;  %v1494_v38 = vld [vmem:[#allocation8 + $0x1d0] ss:$12 sps:$4 sm:$0xff]   ;;  %v1506_v50 = vld [vmem:[#allocation8 + $0x248] ss:$12 sps:$4 sm:$0xff]  }
  0x67   :  { %831 = vmatprep.subr.bf16.mxu1 %v1476_v53  ;;  %v1509_v53 = vld [vmem:[#allocation10 + $0x78] sm:$0xff]  }
  0x69   :  { %797 = vmatpush2.bf16.msra.mxu0 %v1441_v39  ;;  %v1495_v39 = vld [vmem:[#allocation8 + $0x128] ss:$12 sps:$4 sm:$0xff]  }
  0x6a   :  { %798 = vmatprep.subr.bf16.mxu0 %v1442_v40  ;;  %832 = vmatpush1.bf16.msra.mxu1 %v1474_v54  ;;  %v1496_v40 = vld [vmem:[#allocation8 + $0x68] ss:$12 sps:$4 sm:$0xff]  }
  0x6b   :  { %833 = vmatprep.subr.bf16.mxu1 %v1480_v56  ;;  %v1510_v54 = vld [vmem:[#allocation10 + $0x38] sm:$0xff]   ;;  %v1512_v56 = vld [vmem:[#allocation10 + $0x30] sm:$0xff]  }
  0x6d   :  { %799 = vmatpush2.bf16.msra.mxu0 %v1447_v41  ;;  %v1497_v41 = vld [vmem:[#allocation8 + $0x1b8] ss:$12 sps:$4 sm:$0xff]  }
  0x6e   :  { %800 = vmatprep.subr.bf16.mxu0 %v1448_v42  ;;  %834 = vmatpush1.bf16.msra.mxu1 %v1478_v57  ;;  %v1498_v42 = vld [vmem:[#allocation8 + $0x110] ss:$12 sps:$4 sm:$0xff]   ;;  %v1513_v57 = vld [vmem:[#allocation10 + $0x68] sm:$0xff]  }
  0x6f   :  { %849 = vmatprep.subr.bf16.mxu1 %v1484_v58  ;;  %v1514_v58 = vld [vmem:[#allocation10 + $0x28] sm:$0xff]  }
  0x71   :  { %801 = vmatpush2.bf16.msra.mxu0 %v1453_v43  ;;  %v1499_v43 = vld [vmem:[#allocation8 + $0x50] ss:$12 sps:$4 sm:$0xff]  }
  0x72   :  { %802 = vmatprep.subr.bf16.mxu0 %v1454_v44  ;;  %850 = vmatpush2.bf16.msra.mxu1 %v1482_v59  ;;  %v1500_v44 = vld [vmem:[#allocation8 + $0x1a0] ss:$12 sps:$4 sm:$0xff]   ;;  %v1516_v59 = vld [vmem:[#allocation10 + $0x20] sm:$0xff]  }
  0x73   :  { %1324 = vmatprep.subr.bf16.mxu1 %v1486_v60  ;;  %v1517_v60 = vld [vmem:[#allocation10 + $0x58] sm:$0xff]  }
  0x75   :  { %803 = vmatpush2.bf16.msra.mxu0 %v1459_v45  ;;  %v1501_v45 = vld [vmem:[#allocation8 + $0xf8] ss:$12 sps:$4 sm:$0xff]  }
  0x76   :  { %804 = vmatprep.subr.bf16.mxu0 %v1460_v46  ;;  %v1502_v46 = vld [vmem:[#allocation8 + $0x38] ss:$12 sps:$4 sm:$0xff]  }
  0x79   :  { %805 = vmatpush2.bf16.msra.mxu0 %v1465_v47  ;;  %v1503_v47 = vld [vmem:[#allocation8 + $0x188] ss:$12 sps:$4 sm:$0xff]  }
  0x7a   :  { %806 = vmatprep.subr.bf16.mxu0 %v1466_v48  ;;  %v1504_v48 = vld [vmem:[#allocation8 + $0xe0] ss:$12 sps:$4 sm:$0xff]  }
  0x7d   :  { %807 = vmatpush2.bf16.msra.mxu0 %v1471_v51  ;;  %v1507_v51 = vld [vmem:[#allocation8 + $0xc8] ss:$12 sps:$4 sm:$0xff]  }
  0x7e   :  { %808 = vmatprep.subr.bf16.mxu0 %v1472_v52  ;;  %v1508_v52 = vld [vmem:[#allocation8 + $0x8] ss:$12 sps:$4 sm:$0xff]  }
  0x81   :  { %809 = vmatpush2.bf16.msra.mxu0 %v1477_v55  ;;  %v1511_v55 = vld [vmem:[#allocation10 + $0x70] sm:$0xff]  }
  0x82   :  { %900 = vmatprep.subr.bf16.mxu0 %v1667_v0 }
 0x109   :  { %v201_v5 = vpop.f32.mrf.mxu1 }
 0x10a   :  { %v202_v6 = vadd.f32 %v201_v5, %v106_v3  ;;  %v1519_v3 = vld [vmem:[#allocation10 + $0x50] sm:$0xff]   ;;  %v1521_v5 = vld [vmem:[#allocation10 + $0x48] sm:$0xff]  }
 0x10b   :  { %v203_v8 = vpop.f32.mrf.mxu1 }
 0x10c   :  { %v204_v9 = vadd.f32 %v203_v8, %v110_v4  ;;  %v249_v11 = vmax.f32 %v202_v6, 0.0  ;;  %v1520_v4 = vld [vmem:[#allocation10 + $0x10] sm:$0xff]   ;;  %v1522_v6 = vld [vmem:[#allocation10 + $0x8] sm:$0xff]   ;;  %v1523_v8 = vld [vmem:[#allocation10 + $0x40] sm:$0xff]  }
 0x10d   :  { %v205_v12 = vpop.f32.mrf.mxu1 }
 0x10e   :  { %v250_v13 = vmax.f32 %v204_v9, 0.0  ;;  %v1744_v19 = vpack.c.bf16 %v249_v11, %v249_v11  ;;  %v1524_v9 = vld [vmem:[#allocation10] sm:$0xff]   ;;  %v1668_v11 = vmov 0.0   ;;  %v1110_v12 = vsel %vm1108_vm2, %v1525_v10, 0 }
 0x10f   :  { %v206_v15 = vpop.f32.mrf.mxu1 }
 0x110   :  { %v254_v16 = vpack.c.bf16 %v250_v13, %v250_v13  ;;  %v1526_v13 = vld [vmem:[#allocation10 + $0x88] sm:$0xff]   ;;  %v357_v15 = vld [vmem:[%s1776_s4] sm:$0x7] }
 0x111   :  { %v242_v20 = vpop.f32.mrf.mxu1 }
 0x112   :  { %v243_v21 = vadd.f32 %v242_v20, %v114_v14  ;;  %810 = vmatprep.mubr.bf16.mxu0 %v254_v16  ;;  %v1527_v14 = vld [vmem:[#allocation10 + $0x80] sm:$0xff]   ;;  %v366_v20 = vrot.slane %v357_v15, %v109_v2  ;;  %v370_v2 = vrot.slane %v357_v15, %v113_v7 }
 0x113   :  { %v244_v22 = vpop.f32.mrf.mxu1  ;;  %811 = vmatmul.mubr.bf16.vlgmr.msra.gmra.mxu0 %v1744_v19 }
 0x114   :  { %v245_v23 = vadd.f32 %v244_v22, %v118_v17  ;;  %901 = vmatpush1.bf16.msra.mxu0 %v1481_v18  ;;  %v251_v25 = vmax.f32 %v243_v21, 0.0  ;;  %v362_v18 = vrot.slane %v357_v15, %v105_v63 }
 0x115   :  { %v246_v26 = vpop.f32.mrf.mxu1  ;;  %902 = vmatprep.subr.bf16.mxu0 %v1667_v0 }
 0x116   :  { %v252_v27 = vmax.f32 %v245_v23, 0.0  ;;  %v255_v32 = vpack.c.bf16 %v251_v25, %v251_v25 }
 0x117   :  { %v247_v28 = vpop.f32.mrf.mxu1 }
 0x118   :  { %v256_v29 = vpack.c.bf16 %v252_v27, %v252_v27  ;;  %903 = vmatpush1.bf16.msra.mxu0 %v1485_v24 }
 0x119   :  { %904 = vmatprep.subr.bf16.mxu0 %v1667_v0 }
 0x11a   :  { %1301 = vmatprep.mubr.msk.bf16.mxu1 %vm774_vm1, %v256_v29  ;;  %1302 = vmatprep.mubr.msk.bf16.mxu0 %vm774_vm1, %v256_v29 }
 0x11b   :  { %852 = vmatmul.mubr.bf16.vlgmr.msra.gmra.mxu1 %v255_v32 }
 0x11c   :  { %1325 = vmatpush3.bf16.msra.mxu1 %v1487_v30  ;;  %905 = vmatpush1.bf16.msra.mxu0 %v1488_v31 }
 0x11d   :  { %892 = vmatprep.mubr.bf16.mxu1 %v254_v16  ;;  %1326 = vmatprep.subr.bf16.mxu1 %v1489_v33 }
 0x11e   :  { %906 = vmatprep.subr.bf16.mxu0 %v1667_v0 }
 0x120   :  { %1327 = vmatpush3.bf16.msra.mxu1 %v1490_v34  ;;  %907 = vmatpush1.bf16.msra.mxu0 %v1491_v35 }
 0x121   :  { %1328 = vmatprep.subr.bf16.mxu1 %v1492_v36  ;;  %908 = vmatprep.subr.bf16.mxu0 %v1667_v0 }
 0x124   :  { %1329 = vmatpush3.bf16.msra.mxu1 %v1493_v37  ;;  %909 = vmatpush1.bf16.msra.mxu0 %v1494_v38 }
 0x125   :  { %1330 = vmatprep.subr.bf16.mxu1 %v1495_v39  ;;  %910 = vmatprep.subr.bf16.mxu0 %v1667_v0 }
 0x128   :  { %1331 = vmatpush3.bf16.msra.mxu1 %v1496_v40  ;;  %911 = vmatpush1.bf16.msra.mxu0 %v1497_v41 }
 0x129   :  { %1332 = vmatprep.subr.bf16.mxu1 %v1498_v42  ;;  %912 = vmatprep.subr.bf16.mxu0 %v1667_v0 }
 0x12c   :  { %1333 = vmatpush3.bf16.msra.mxu1 %v1499_v43  ;;  %913 = vmatpush1.bf16.msra.mxu0 %v1500_v44 }
 0x12d   :  { %1334 = vmatprep.subr.bf16.mxu1 %v1501_v45  ;;  %914 = vmatprep.subr.bf16.mxu0 %v1667_v0 }
 0x130   :  { %1335 = vmatpush3.bf16.msra.mxu1 %v1502_v46  ;;  %915 = vmatpush1.bf16.msra.mxu0 %v1503_v47 }
 0x131   :  { %1336 = vmatprep.subr.bf16.mxu1 %v1504_v48  ;;  %930 = vmatprep.subr.bf16.mxu0 %v1667_v0  ;;  %v1515_v0 = vld [vmem:[#allocation10 + $0x60] sm:$0xff]  }
 0x134   :  { %1337 = vmatpush3.bf16.msra.mxu1 %v1505_v49  ;;  %931 = vmatpush2.bf16.msra.mxu0 %v1506_v50 }
 0x135   :  { %1338 = vmatprep.subr.bf16.mxu1 %v1507_v51  ;;  %1372 = vmatprep.subr.bf16.mxu0 %v1668_v11 }
 0x137   :  { %933 = vmatmul.mubr.bf16.vlgmr.msra.gmra.mxu0 %v255_v32 }
 0x138   :  { %1339 = vmatpush3.bf16.msra.mxu1 %v1508_v52  ;;  %1373 = vmatpush3.bf16.msra.mxu0 %v1110_v12  ;;  %v1193_v52 = vand.u32 127, %v103_v61 }
 0x139   :  { %1346 = vmatprep.subr.bf16.mxu1 %v1509_v53  ;;  %1374 = vmatprep.subr.bf16.mxu0 %v1668_v11 }
 0x13a   :  { %1378 = vmatprep.mubr.msk.bf16.mxu0 %vm1669_vm3, %v1668_v11  ;;  %vm1196_vm5 = vcmp.ge.s32.totalorder %v1193_v52, 8 }
 0x13b   :  { %893 = vmatmul.mubr.bf16.vlgmr.msra.gmra.mxu1 %v1744_v19 }
 0x13c   :  { %1347 = vmatpush3.bf16.msra.mxu1 %v1510_v54  ;;  %1375 = vmatpush3.bf16.msra.mxu0 %v1526_v13 }
 0x13d   :  { %1348 = vmatprep.subr.bf16.mxu1 %v1511_v55  ;;  %1376 = vmatprep.subr.bf16.mxu0 %v1668_v11 }
 0x140   :  { %1349 = vmatpush3.bf16.msra.mxu1 %v1512_v56  ;;  %1377 = vmatpush3.bf16.msra.mxu0 %v1527_v14 }
 0x141   :  { %1350 = vmatprep.subr.bf16.mxu1 %v1513_v57 }
 0x144   :  { %1351 = vmatpush3.bf16.msra.mxu1 %v1514_v58 }
 0x145   :  { %1352 = vmatprep.subr.bf16.mxu1 %v1515_v0 }
 0x148   :  { %1353 = vmatpush3.bf16.msra.mxu1 %v1516_v59 }
 0x149   :  { %1354 = vmatprep.subr.bf16.mxu1 %v1517_v60 }
 0x14c   :  { %1355 = vmatpush3.bf16.msra.mxu1 %v1518_v1 }
 0x14d   :  { %1356 = vmatprep.subr.bf16.mxu1 %v1519_v3 }
 0x150   :  { %1357 = vmatpush3.bf16.msra.mxu1 %v1520_v4 }
 0x151   :  { %1358 = vmatprep.subr.bf16.mxu1 %v1521_v5 }
 0x154   :  { %1359 = vmatpush3.bf16.msra.mxu1 %v1522_v6 }
 0x155   :  { %1360 = vmatprep.subr.bf16.mxu1 %v1523_v8 }
 0x158   :  { %1361 = vmatpush3.bf16.msra.mxu1 %v1524_v9 }
 0x1d3   :  { %v812_v16 = vpop.f32.mrf.mxu0 }
 0x1d4   :  { %v813_v22 = vadd.f32 %v812_v16, %v362_v18 }
 0x1d5   :  { %v814_v17 = vpop.f32.mrf.mxu0 }
 0x1d6   :  { %v815_v24 = vadd.f32 %v814_v17, %v366_v20 }
 0x1d7   :  { %v816_v19 = vpop.f32.mrf.mxu0 }
 0x1d9   :  { %v817_v21 = vpop.f32.mrf.mxu0 }
 0x1db   :  { %v853_v23 = vpop.f32.mrf.mxu1 }
 0x1dc   :  { %v854_v25 = vadd.f32 %v853_v23, %v813_v22 }
 0x1dd   :  { %v855_v26 = vpop.f32.mrf.mxu1 }
 0x1de   :  { %v856_v27 = vadd.f32 %v855_v26, %v815_v24  ;;  %v940_v28 = vmax.f32 %v854_v25, 0.0 }
 0x1df   :  { %v857_v29 = vpop.f32.mrf.mxu1 }
 0x1e0   :  { %v941_v30 = vmax.f32 %v856_v27, 0.0  ;;  %v943_v33 = vpack.c.bf16 %v940_v28, %v940_v28 }
 0x1e1   :  { %v858_v31 = vpop.f32.mrf.mxu1 }
 0x1e2   :  { %v944_v32 = vpack.c.bf16 %v941_v30, %v941_v30 }
 0x1e4   :  { %1144 = vmatprep.mubr.bf16.mxu1 %v944_v32 }
 0x1e5   :  { %1145 = vmatmul.mubr.bf16.vlgmr.msra.gmra.mxu1 %v943_v33 }
 0x1f7   :  { %v934_v63 = vpop.f32.mrf.mxu0 }
 0x1f9   :  { %v936_v34 = vpop.f32.mrf.mxu0 }
 0x1fb   :  { %v1340_v35 = vpop.f32.mrf.mxu1  ;;  %v937_v36 = vpop.f32.mrf.mxu0 }
 0x1fd   :  { %v1341_v37 = vpop.f32.mrf.mxu1  ;;  %v938_v38 = vpop.f32.mrf.mxu0 }
 0x1fe   :  { %v1342_v39 = vadd.f32 %v1341_v37, %v1340_v35 }
 0x1ff   :  { %v1343_v40 = vpop.f32.mrf.mxu1 }
 0x200   :  { %v895_v41 = vadd.f32 %v1342_v39, %v370_v2 }
 0x201   :  { %v1344_v42 = vpop.f32.mrf.mxu1 }
 0x202   :  { %v935_v43 = vadd.f32 %v934_v63, %v895_v41 }
 0x204   :  { %v942_v44 = vmax.f32 %v935_v43, 0.0 }
 0x206   :  { %v945_v45 = vpack.c.bf16 %v942_v44, %v942_v44 }
 0x208   :  { %1379 = vmatmul.mubr.msk.bf16.vlgmr.msra.gmra.mxu0 %vm1104_vm4, %v945_v45 }
 0x2a5   :  { %v1362_v46 = vpop.f32.mrf.mxu1 }
 0x2a7   :  { %v1363_v47 = vpop.f32.mrf.mxu1 }
 0x2a8   :  { %v1364_v50 = vadd.f32 %v1363_v47, %v1362_v46 }
 0x2a9   :  { %v1365_v48 = vpop.f32.mrf.mxu1 }
 0x2aa   :  { %v1147_v7 = vadd.f32 %v1364_v50, %v1303_v62 }
 0x2ab   :  { %v1366_v49 = vpop.f32.mrf.mxu1 }
 0x2c8   :  { %v1186_v51 = vpop.f32.mrf.mxu0 }
 0x2c9   :  { %v1187_v53 = vadd.f32 %v1186_v51, %v1147_v7 }
 0x2ca   :  { %v1380_v54 = vpop.f32.mrf.mxu0 }
 0x2cb   :  { %v1194_v55 = vmax.f32 %v1187_v53, -20.0 }
 0x2cc   :  { %v1189_v56 = vpop.f32.mrf.mxu0 }
 0x2cd   :  { %v1195_v57 = vmin.f32 %v1194_v55, 2.0 }
 0x2ce   :  { %v1381_v58 = vpop.f32.mrf.mxu0 }
 0x2cf   :  { %v1197_v0 = vsel %vm1196_vm5, %v1195_v57, %v1187_v53 }
 0x2d0   :  { %1198 = vst [vmem:[#allocation11] sm:$0xff] %v1197_v0 }
 0x2d1   :  { %1639 = shalt.err (!%p1636_p1)
}
 0x2d2   :  { %1208 = dma.vmem_to_hbm [thread:$0]  %s1206_s8, 128, %s1779_s7, [#allocation4]  }
 0x2d3   :  { %1654 = dma.done.wait [#allocation4], 128  }
 0x2d4   :  { %1655 = vsyncadd [#allocation4], 4294967168 }
 0x2d5   :  { %1212 = vsyncpa [#allocation3], 1 }
 0x2d6   :  { %1213 = vsyncpa [#allocation6], 1 }
 0x2d7   :  { %1214 = vsyncpa [#allocation9], 1 }
 0x2d8   :  { %1215 = vsyncpa [#allocation4], 1 }

</bundles_post_ra>
